<compile_context>
chip_gen: v7x
topology: tpu7x:2x2x1
jax: 0.10.0
libtpu: 0.0.40
codegen_flags: <defaults>
</compile_context>

<pallas_src>
import functools

import jax
import jax.numpy as jnp
from jax import lax
from jax.experimental import pallas as pl
from jax.experimental.pallas import tpu as pltpu


# --------------------------------------------------------------------------
# kernel
# --------------------------------------------------------------------------
def _bpnet_kernel(*refs, num_mid_layers, activation, compute_dtype,
                  elementwise_dtype):
    if num_mid_layers > 0:
        x_ref, w_in_ref, w_mid_ref, side_ref, b_out_ref, o_ref = refs
    else:
        x_ref, w_in_ref, side_ref, b_out_ref, o_ref = refs
        w_mid_ref = None

    def act(v):
        if activation == "relu":
            return jnp.maximum(v, 0.0)
        elif activation == "sigmoid":
            return jax.nn.sigmoid(v)
        else:  # tanh
            return jnp.tanh(v)

    ew = elementwise_dtype

    # in_layer: h = W_in @ x_tile^T  -> (mid_planes, tile_m), batch on lanes.
    # NT contraction (both operands contract on in_planes) fuses the x
    # transpose into the kernel; cast to bf16 happens on the VMEM tile.
    x = x_ref[...].astype(compute_dtype)                     # (tile_m, in)
    h32 = lax.dot_general(w_in_ref[...], x,
                          (((1,), (1,)), ((), ())),
                          preferred_element_type=jnp.float32)  # (mid, tile_m)
    h = act(h32.astype(ew) + side_ref[0].astype(ew))          # b_in
    # TODO(synk): nn.Dropout(p=0.5) is identity here (eval mode).

    # mid_layer: (num_layers - 1) x [Linear(mid, mid) + activation]
    for i in range(num_mid_layers):
        h32 = jnp.dot(w_mid_ref[i], h.astype(compute_dtype),
                      preferred_element_type=jnp.float32)
        h = act(h32.astype(ew) + side_ref[i + 1].astype(ew))  # b_mid[i]

    # out_layer Linear(mid, 1): VPU multiply + sublane reduce (f32 accumulate);
    # scalar bias comes from SMEM.
    w_out_col = side_ref[num_mid_layers + 1]                  # (mid, 1) f32
    out = jnp.sum(h.astype(jnp.float32) * w_out_col, axis=0, keepdims=True)
    o_ref[...] = (out + b_out_ref[0]).astype(o_ref.dtype)     # (1, tile_m)


# --------------------------------------------------------------------------
# per-generation heuristics
# --------------------------------------------------------------------------
def _num_tensorcores():
    """2 TensorCores per chip on v7x, 1 on v5e/v6e."""
    try:
        kind = jax.devices()[0].device_kind.lower()
        return 2 if "v7" in kind else 1
    except Exception:
        return 1


def _default_elementwise_dtype(compute_dtype):
    """bf16 elementwise chain on v6e/v7x; f32 on v5e (no bf16 VPU/EUP)."""
    try:
        kind = jax.devices()[0].device_kind.lower()
        if "v5" in kind:
            return jnp.float32
    except Exception:
        pass
    return compute_dtype


def _pick_tile_m(batch, num_tc, cap=1024):
    """Largest multiple-of-128 divisor of batch, capped for vreg pressure.

    On 2-TC chips (v7x) prefer a tile that keeps the grid a multiple of 2 so
    the "parallel" batch axis shards across both TensorCores; on single-TC
    chips (v5e/v6e) prefer grid=(1,) to avoid per-step overhead.
    """
    assert batch % 128 == 0, "batch must be a multiple of 128 lanes"

    def largest_divisor(limit):
        best = 0
        for m in range(128, min(batch, limit) + 1, 128):
            if batch % m == 0:
                best = m
        return best

    if num_tc >= 2 and batch >= 256:
        t = largest_divisor(min(cap, batch // 2))
        if t:
            return t
    return largest_divisor(cap) or batch


# --------------------------------------------------------------------------
# wrapper
# --------------------------------------------------------------------------
def bpnet_forward(x, params, *, num_layers, activation="relu", tile_m=None,
                  compute_dtype=jnp.bfloat16, elementwise_dtype=None):
    """x: (B, in_planes) float32 -> (B, 1) float32."""
    B, in_planes = x.shape
    w_in, b_in, w_mid, b_mid, w_out, b_out = params
    mid_planes = w_in.shape[0]
    num_mid = num_layers - 1

    if elementwise_dtype is None:
        elementwise_dtype = _default_elementwise_dtype(compute_dtype)
    if tile_m is None:
        tile_m = _pick_tile_m(B, _num_tensorcores())
    assert tile_m % 128 == 0, "tile_m must be a multiple of 128 lanes"
    assert B % tile_m == 0, "batch must be a multiple of tile_m"

    # One-time weight packing (tiny arrays; in a real deployment these would
    # be precomputed once and cached).  x itself is NOT touched on the host.
    w_in_c = w_in.astype(compute_dtype)                               # (mid, in)
    side = [b_in.reshape(1, mid_planes, 1)]
    if num_mid > 0:
        w_mid_c = w_mid.astype(compute_dtype)                         # (L-1, mid, mid)
        side.append(b_mid.reshape(num_mid, mid_planes, 1))
    side.append(w_out.reshape(1, mid_planes, 1))
    side_slab = jnp.concatenate(side, axis=0).astype(jnp.float32)     # (num_mid+2, mid, 1)
    b_out_c = b_out.reshape(1).astype(jnp.float32)                    # (1,) SMEM scalar

    # NOTE: weight/bias specs have constant index maps (resident every grid
    # step).  For LARGE mid_planes / num_mid add pipeline_mode=pl.Buffered(1)
    # on them and raise vmem_limit_bytes (v7x: 64 MiB physical / 32 MiB scoped,
    # v5e: 16 MiB scoped default); at mid_planes=32 the slabs are a few KiB.
    in_specs = [
        pl.BlockSpec((tile_m, in_planes), lambda i: (i, 0)),          # x tile (f32)
        pl.BlockSpec((mid_planes, in_planes), lambda i: (0, 0)),      # W_in
    ]
    args = [x, w_in_c]
    if num_mid > 0:
        in_specs.append(
            pl.BlockSpec((num_mid, mid_planes, mid_planes), lambda i: (0, 0, 0)))
        args.append(w_mid_c)
    in_specs += [
        pl.BlockSpec((num_mid + 2, mid_planes, 1), lambda i: (0, 0, 0)),  # b_in|b_mid|w_out
        pl.BlockSpec(memory_space=pltpu.MemorySpace.SMEM),                # b_out scalar
    ]
    args += [side_slab, b_out_c]

    flops = 2 * B * (in_planes * mid_planes
                     + num_mid * mid_planes * mid_planes
                     + mid_planes)
    transcendentals = (B * mid_planes * num_layers
                       if activation in ("sigmoid", "tanh") else 0)
    bytes_accessed = int(sum(int(a.nbytes) for a in args)) + B * 4

    kernel = functools.partial(_bpnet_kernel,
                               num_mid_layers=num_mid,
                               activation=activation,
                               compute_dtype=compute_dtype,
                               elementwise_dtype=elementwise_dtype)

    out = pl.pallas_call(
        kernel,
        out_shape=jax.ShapeDtypeStruct((1, B), jnp.float32),
        grid_spec=pltpu.PrefetchScalarGridSpec(
            num_scalar_prefetch=0,
            grid=(B // tile_m,),
            in_specs=in_specs,
            out_specs=pl.BlockSpec((1, tile_m), lambda i: (0, i)),
        ),
        compiler_params=pltpu.CompilerParams(
            dimension_semantics=("parallel",)),
        cost_estimate=pl.CostEstimate(flops=flops,
                                      transcendentals=transcendentals,
                                      bytes_accessed=bytes_accessed),
    )(*args)
    return out.reshape(B, 1)   # (1,B)->(B,1) is a trivial row-major reshape


# --------------------------------------------------------------------------
# params + reference
# --------------------------------------------------------------------------
def init_bpnet_params(key, num_layers, in_planes, mid_planes):
    """Xavier-normal weights (gain=1), zero biases — matches weights_init_xavier.

    Weights are stored in PyTorch's (fan_out, fan_in) layout.
    """
    def xavier_normal(k, fan_out, fan_in):
        std = (2.0 / (fan_in + fan_out)) ** 0.5
        return std * jax.random.normal(k, (fan_out, fan_in), dtype=jnp.float32)

    num_mid = num_layers - 1
    keys = jax.random.split(key, 2 + max(num_mid, 1))
    w_in = xavier_normal(keys[0], mid_planes, in_planes)
    b_in = jnp.zeros((mid_planes,), jnp.float32)
    if num_mid > 0:
        w_mid = jnp.stack([xavier_normal(keys[2 + i], mid_planes, mid_planes)
                           for i in range(num_mid)])
        b_mid = jnp.zeros((num_mid, mid_planes), jnp.float32)
    else:
        w_mid = None
        b_mid = None
    w_out = xavier_normal(keys[1], 1, mid_planes)       # (1, mid)
    b_out = jnp.zeros((1,), jnp.float32)
    return w_in, b_in, w_mid, b_mid, w_out, b_out


def _reference_forward(x, params, num_layers, activation="relu",
                       compute_dtype=jnp.bfloat16,
                       elementwise_dtype=jnp.float32):
    """Plain-JAX reference (eval-mode dropout), same dtype path as the kernel."""
    w_in, b_in, w_mid, b_mid, w_out, b_out = params
    act = {"relu": lambda v: jnp.maximum(v, 0.0),
           "sigmoid": jax.nn.sigmoid,
           "tanh": jnp.tanh}[activation]
    ew = elementwise_dtype

    def matmul(a, w):  # a: (B, fan_in), w: (fan_out, fan_in)
        return jnp.dot(a.astype(compute_dtype), w.T.astype(compute_dtype),
                       preferred_element_type=jnp.float32)

    h = act(matmul(x, w_in).astype(ew) + b_in.astype(ew)[None, :])
    for i in range(num_layers - 1):
        h = act(matmul(h, w_mid[i]).astype(ew) + b_mid[i].astype(ew)[None, :])
    out = jnp.sum(h.astype(jnp.float32)
                  * w_out.reshape(1, -1).astype(jnp.float32),
                  axis=1, keepdims=True)
    return out + b_out.astype(jnp.float32)


# --------------------------------------------------------------------------
if __name__ == "__main__":
    # Small shapes consistent with the module: x is (batch, in_planes).
    num_layers = 3
    in_planes = 32
    mid_planes = 32
    batch = 512

    key = jax.random.PRNGKey(0)
    kx, kp = jax.random.split(key)
    x = jax.random.normal(kx, (batch, in_planes), dtype=jnp.float32)
    params = init_bpnet_params(kp, num_layers, in_planes, mid_planes)

    compute_dtype = jnp.bfloat16
    ew_dtype = _default_elementwise_dtype(compute_dtype)

    out = bpnet_forward(x, params, num_layers=num_layers, activation="relu",
                        compute_dtype=compute_dtype, elementwise_dtype=ew_dtype)
    out = jax.block_until_ready(out)

    ref = _reference_forward(x, params, num_layers, "relu",
                             compute_dtype=compute_dtype,
                             elementwise_dtype=ew_dtype)
    assert out.shape == (batch, 1)
    assert jnp.allclose(out, ref, atol=1e-3, rtol=1e-3), \
        float(jnp.max(jnp.abs(out - ref)))

    print("KERNEL_OK")
</pallas_src>

<mosaic_0001>
module attributes {stable_mosaic.version = 11 : i64} {
  func.func @_bpnet_kernel(%arg0: i32, %arg1: memref<512x32xf32, #tpu.memory_space<vmem>>, %arg2: memref<32x32xbf16, #tpu.memory_space<vmem>>, %arg3: memref<2x32x32xbf16, #tpu.memory_space<vmem>>, %arg4: memref<4x32x1xf32, #tpu.memory_space<vmem>>, %arg5: memref<1xf32, #tpu.memory_space<smem>>, %arg6: memref<1x512xf32, #tpu.memory_space<vmem>>) attributes {dimension_semantics = [#tpu.dimension_semantics<parallel>], iteration_bounds = array<i64: 1>, scalar_prefetch = 0 : i64, scratch_operands = 0 : i64, tpu.core_type = #tpu.core_type<tc>, window_params = [{transform_indices = @transform_0, window_bounds = array<i64: 512, 32>}, {pipeline_mode = #tpu.pipeline_mode<synchronous>, transform_indices = @transform_1, window_bounds = array<i64: 32, 32>}, {pipeline_mode = #tpu.pipeline_mode<synchronous>, transform_indices = @transform_2, window_bounds = array<i64: 2, 32, 32>}, {pipeline_mode = #tpu.pipeline_mode<synchronous>, transform_indices = @transform_3, window_bounds = array<i64: 4, 32, 1>}, {transform_indices = @transform_4, window_bounds = array<i64: 1>}, {transform_indices = @transform_5, window_bounds = array<i64: 1, 512>}]} {
    %c0 = arith.constant 0 : index
    %c0_0 = arith.constant 0 : index
    %0 = vector.load %arg1[%c0, %c0_0] : memref<512x32xf32, #tpu.memory_space<vmem>>, vector<512x32xf32>
    %1 = arith.truncf %0 : vector<512x32xf32> to vector<512x32xbf16>
    %c0_1 = arith.constant 0 : index
    %c0_2 = arith.constant 0 : index
    %2 = vector.load %arg2[%c0_1, %c0_2] : memref<32x32xbf16, #tpu.memory_space<vmem>>, vector<32x32xbf16>
    %cst = arith.constant dense<0.000000e+00> : vector<32x512xf32>
    %3 = tpu.matmul %2, %1, %cst {dimension_numbers = #tpu.dot_dimension_numbers<[1], [1], [0], [0], [0, 0, 1, 0], [], []>} : vector<32x32xbf16>, vector<512x32xbf16>, vector<32x512xf32> -> vector<32x512xf32>
    %4 = arith.truncf %3 : vector<32x512xf32> to vector<32x512xbf16>
    %c0_3 = arith.constant 0 : index
    %c0_4 = arith.constant 0 : index
    %c0_5 = arith.constant 0 : index
    %5 = vector.load %arg4[%c0_3, %c0_4, %c0_5] : memref<4x32x1xf32, #tpu.memory_space<vmem>>, vector<1x32x1xf32>
    %6 = vector.shape_cast %5 : vector<1x32x1xf32> to vector<32x1xf32>
    %7 = arith.truncf %6 : vector<32x1xf32> to vector<32x1xbf16>
    %8 = vector.broadcast %7 : vector<32x1xbf16> to vector<32x512xbf16>
    %9 = arith.addf %4, %8 : vector<32x512xbf16>
    %cst_6 = arith.constant 0.000000e+00 : bf16
    %10 = vector.broadcast %cst_6 : bf16 to vector<32x512xbf16>
    %11 = arith.maximumf %9, %10 : vector<32x512xbf16>
    %c0_7 = arith.constant 0 : index
    %c0_8 = arith.constant 0 : index
    %c0_9 = arith.constant 0 : index
    %12 = vector.load %arg3[%c0_7, %c0_8, %c0_9] : memref<2x32x32xbf16, #tpu.memory_space<vmem>>, vector<1x32x32xbf16>
    %13 = vector.shape_cast %12 : vector<1x32x32xbf16> to vector<32x32xbf16>
    %cst_10 = arith.constant dense<0.000000e+00> : vector<32x512xf32>
    %14 = tpu.matmul %13, %11, %cst_10 {dimension_numbers = #tpu.dot_dimension_numbers<[1], [0], [0], [1], [0, 0, 1, 1], [], []>} : vector<32x32xbf16>, vector<32x512xbf16>, vector<32x512xf32> -> vector<32x512xf32>
    %15 = arith.truncf %14 : vector<32x512xf32> to vector<32x512xbf16>
    %c1 = arith.constant 1 : index
    %c0_11 = arith.constant 0 : index
    %c0_12 = arith.constant 0 : index
    %16 = vector.load %arg4[%c1, %c0_11, %c0_12] : memref<4x32x1xf32, #tpu.memory_space<vmem>>, vector<1x32x1xf32>
    %17 = vector.shape_cast %16 : vector<1x32x1xf32> to vector<32x1xf32>
    %18 = arith.truncf %17 : vector<32x1xf32> to vector<32x1xbf16>
    %19 = vector.broadcast %18 : vector<32x1xbf16> to vector<32x512xbf16>
    %20 = arith.addf %15, %19 : vector<32x512xbf16>
    %cst_13 = arith.constant 0.000000e+00 : bf16
    %21 = vector.broadcast %cst_13 : bf16 to vector<32x512xbf16>
    %22 = arith.maximumf %20, %21 : vector<32x512xbf16>
    %c1_14 = arith.constant 1 : index
    %c0_15 = arith.constant 0 : index
    %c0_16 = arith.constant 0 : index
    %23 = vector.load %arg3[%c1_14, %c0_15, %c0_16] : memref<2x32x32xbf16, #tpu.memory_space<vmem>>, vector<1x32x32xbf16>
    %24 = vector.shape_cast %23 : vector<1x32x32xbf16> to vector<32x32xbf16>
    %cst_17 = arith.constant dense<0.000000e+00> : vector<32x512xf32>
    %25 = tpu.matmul %24, %22, %cst_17 {dimension_numbers = #tpu.dot_dimension_numbers<[1], [0], [0], [1], [0, 0, 1, 1], [], []>} : vector<32x32xbf16>, vector<32x512xbf16>, vector<32x512xf32> -> vector<32x512xf32>
    %26 = arith.truncf %25 : vector<32x512xf32> to vector<32x512xbf16>
    %c2 = arith.constant 2 : index
    %c0_18 = arith.constant 0 : index
    %c0_19 = arith.constant 0 : index
    %27 = vector.load %arg4[%c2, %c0_18, %c0_19] : memref<4x32x1xf32, #tpu.memory_space<vmem>>, vector<1x32x1xf32>
    %28 = vector.shape_cast %27 : vector<1x32x1xf32> to vector<32x1xf32>
    %29 = arith.truncf %28 : vector<32x1xf32> to vector<32x1xbf16>
    %30 = vector.broadcast %29 : vector<32x1xbf16> to vector<32x512xbf16>
    %31 = arith.addf %26, %30 : vector<32x512xbf16>
    %cst_20 = arith.constant 0.000000e+00 : bf16
    %32 = vector.broadcast %cst_20 : bf16 to vector<32x512xbf16>
    %33 = arith.maximumf %31, %32 : vector<32x512xbf16>
    %c3 = arith.constant 3 : index
    %c0_21 = arith.constant 0 : index
    %c0_22 = arith.constant 0 : index
    %34 = vector.load %arg4[%c3, %c0_21, %c0_22] : memref<4x32x1xf32, #tpu.memory_space<vmem>>, vector<1x32x1xf32>
    %35 = vector.shape_cast %34 : vector<1x32x1xf32> to vector<32x1xf32>
    %36 = arith.extf %33 : vector<32x512xbf16> to vector<32x512xf32>
    %37 = vector.broadcast %35 : vector<32x1xf32> to vector<32x512xf32>
    %38 = arith.mulf %36, %37 : vector<32x512xf32>
    %cst_23 = arith.constant dense<0.000000e+00> : vector<512xf32>
    %39 = vector.multi_reduction <add>, %38, %cst_23 [0] : vector<32x512xf32> to vector<512xf32>
    %40 = vector.shape_cast %39 : vector<512xf32> to vector<1x512xf32>
    %c0_24 = arith.constant 0 : index
    %41 = memref.load %arg5[%c0_24] : memref<1xf32, #tpu.memory_space<smem>>
    %42 = vector.broadcast %41 : f32 to vector<1x512xf32>
    %43 = arith.addf %40, %42 : vector<1x512xf32>
    %c0_25 = arith.constant 0 : index
    %c0_26 = arith.constant 0 : index
    %44 = vector.load %arg6[%c0_25, %c0_26] : memref<1x512xf32, #tpu.memory_space<vmem>>, vector<1x512xf32>
    tpu.vector_store %arg6[%c0_25, %c0_26], %43 {strides = array<i32>} : memref<1x512xf32, #tpu.memory_space<vmem>>, vector<1x512xf32>,
    return
  }
  func.func @transform_0(%arg0: i32) -> (i32, i32) {
    %c0_i32 = arith.constant 0 : i32
    %c0_i32_0 = arith.constant 0 : i32
    return %arg0, %c0_i32 : i32, i32
  }
  func.func @transform_1(%arg0: i32) -> (i32, i32) {
    %c0_i32 = arith.constant 0 : i32
    %c0_i32_0 = arith.constant 0 : i32
    %c0_i32_1 = arith.constant 0 : i32
    return %c0_i32, %c0_i32_0 : i32, i32
  }
  func.func @transform_2(%arg0: i32) -> (i32, i32, i32) {
    %c0_i32 = arith.constant 0 : i32
    %c0_i32_0 = arith.constant 0 : i32
    %c0_i32_1 = arith.constant 0 : i32
    %c0_i32_2 = arith.constant 0 : i32
    return %c0_i32, %c0_i32_0, %c0_i32_1 : i32, i32, i32
  }
  func.func @transform_3(%arg0: i32) -> (i32, i32, i32) {
    %c0_i32 = arith.constant 0 : i32
    %c0_i32_0 = arith.constant 0 : i32
    %c0_i32_1 = arith.constant 0 : i32
    %c0_i32_2 = arith.constant 0 : i32
    return %c0_i32, %c0_i32_0, %c0_i32_1 : i32, i32, i32
  }
  func.func @transform_4(%arg0: i32) -> i32 {
    %c0_i32 = arith.constant 0 : i32
    %c0_i32_0 = arith.constant 0 : i32
    return %c0_i32 : i32
  }
  func.func @transform_5(%arg0: i32) -> (i32, i32) {
    %c0_i32 = arith.constant 0 : i32
    %c0_i32_0 = arith.constant 0 : i32
    return %c0_i32, %arg0 : i32, i32
  }
}

</mosaic_0001>

<bundles_post_ra>
// kernel: tpu_custom_call.1
= control target key start
LH: loop header
LB: loop body
LE: loop exit
PB: predicated region body
PF: predicated region fallthrough
CT: control target
= control target key end

     0   :  { %vm133_vm0 = vcmask 261120   ;;  %v989_v7 = vmov 0   ;;  %s1383_s0 = inlined_call_operand.vmem [shape: f32[512,32], index: 0, kind: input, shape index: {}]   ;;  %s1384_s1 = inlined_call_operand.vmem [shape: bf16[32,32], index: 1, kind: input, shape index: {}]   ;;  %s1385_s2 = inlined_call_operand.vmem [shape: bf16[2,32,32], index: 2, kind: input, shape index: {}]   ;;  %s1386_s3 = inlined_call_operand.vmem [shape: f32[4,32,1], index: 3, kind: input, shape index: {}]   ;;  %s1387_s4 = inlined_call_operand.<no memory space> [shape: f32[1], index: 4, kind: input, shape index: {}]   ;;  %s1388_s5 = inlined_call_operand.hbm [shape: f32[1,512], index: 5, kind: output, shape index: {}]  }
   0x1   :  { %v39_v0 = vld [vmem:[%s1383_s0 + $0x80] sm:$0xff]  ;;  %v40_v1 = vld [vmem:[%s1383_s0 + $0x88] sm:$0xff]  ;;  %957 = vset.pattern.permute.xlu0 %v989_v7  ;;  %958 = vset.pattern.permute.xlu1 %v989_v7  ;;  %v41_v12 = vld [vmem:[%s1383_s0 + $0x90] sm:$0xff] }
   0x2   :  { %v71_v2 = vld [vmem:[%s1383_s0 + $0x180] sm:$0xff]  ;;  %v95_v3 = vpack.c.bf16 %v40_v1, %v39_v0  ;;  %v72_v4 = vld [vmem:[%s1383_s0 + $0x188] sm:$0xff]  ;;  %v42_v14 = vld [vmem:[%s1383_s0 + $0x98] sm:$0xff] }
   0x3   :  { %v23_v5 = vld [vmem:[%s1383_s0] sm:$0xff]  ;;  %v24_v6 = vld [vmem:[%s1383_s0 + $0x8] sm:$0xff]  ;;  %v111_v8 = vpack.c.bf16 %v72_v4, %v71_v2  ;;  %v73_v15 = vld [vmem:[%s1383_s0 + $0x190] sm:$0xff]  ;;  %v96_v18 = vpack.c.bf16 %v42_v14, %v41_v12 }
   0x4   :  { %v87_v9 = vpack.c.bf16 %v24_v6, %v23_v5  ;;  %v55_v10 = vld [vmem:[%s1383_s0 + $0x100] sm:$0xff]  ;;  %v56_v11 = vld [vmem:[%s1383_s0 + $0x108] sm:$0xff]  ;;  %938 = vmatprep.subr.msk.bf16.mxu0 %vm133_vm0, %v95_v3  ;;  %v74_v16 = vld [vmem:[%s1383_s0 + $0x198] sm:$0xff] }
   0x5   :  { %v103_v13 = vpack.c.bf16 %v56_v11, %v55_v10  ;;  %946 = vmatprep.subr.msk.bf16.mxu1 %vm133_vm0, %v111_v8  ;;  %v112_v19 = vpack.c.bf16 %v74_v16, %v73_v15  ;;  %v25_v20 = vld [vmem:[%s1383_s0 + $0x10] sm:$0xff]  ;;  %v26_v21 = vld [vmem:[%s1383_s0 + $0x18] sm:$0xff]  ;;  %v43_v27 = vld [vmem:[%s1383_s0 + $0xa0] sm:$0xff] }
   0x6   :  { %v141_v17 = vsel %vm133_vm0, %v87_v9, 0  ;;  %v57_v22 = vld [vmem:[%s1383_s0 + $0x110] sm:$0xff]  ;;  %v58_v24 = vld [vmem:[%s1383_s0 + $0x118] sm:$0xff]  ;;  %v88_v25 = vpack.c.bf16 %v26_v21, %v25_v20  ;;  %v44_v28 = vld [vmem:[%s1383_s0 + $0xa8] sm:$0xff] }
   0x7   :  { %899 = vmatpush3.bf16.xpose.msra.mxu0 %v141_v17  ;;  %v189_v23 = vsel %vm133_vm0, %v103_v13, 0  ;;  %v104_v26 = vpack.c.bf16 %v58_v24, %v57_v22  ;;  %v75_v29 = vld [vmem:[%s1383_s0 + $0x1a0] sm:$0xff]  ;;  %v76_v30 = vld [vmem:[%s1383_s0 + $0x1a8] sm:$0xff]  ;;  %v97_v32 = vpack.c.bf16 %v44_v28, %v43_v27  ;;  %v45_v41 = vld [vmem:[%s1383_s0 + $0xb0] sm:$0xff] }
   0x8   :  { %919 = vmatpush3.bf16.xpose.msra.mxu1 %v189_v23  ;;  %939 = vmatprep.subr.msk.bf16.mxu0 %vm133_vm0, %v96_v18  ;;  %v144_v31 = vsel %vm133_vm0, %v88_v25, 0  ;;  %v113_v34 = vpack.c.bf16 %v76_v30, %v75_v29  ;;  %v27_v35 = vld [vmem:[%s1383_s0 + $0x20] sm:$0xff]  ;;  %v28_v36 = vld [vmem:[%s1383_s0 + $0x28] sm:$0xff]  ;;  %v46_v42 = vld [vmem:[%s1383_s0 + $0xb8] sm:$0xff] }
   0x9   :  { %947 = vmatprep.subr.msk.bf16.mxu1 %vm133_vm0, %v112_v19  ;;  %v192_v33 = vsel %vm133_vm0, %v104_v26, 0  ;;  %v59_v37 = vld [vmem:[%s1383_s0 + $0x120] sm:$0xff]  ;;  %v60_v38 = vld [vmem:[%s1383_s0 + $0x128] sm:$0xff]  ;;  %v89_v39 = vpack.c.bf16 %v28_v36, %v27_v35  ;;  %v77_v43 = vld [vmem:[%s1383_s0 + $0x1b0] sm:$0xff]  ;;  %v98_v47 = vpack.c.bf16 %v46_v42, %v45_v41 }
   0xa   :  { %v105_v40 = vpack.c.bf16 %v60_v38, %v59_v37  ;;  %v78_v44 = vld [vmem:[%s1383_s0 + $0x1b8] sm:$0xff]  ;;  %v29_v45 = vld [vmem:[%s1383_s0 + $0x30] sm:$0xff]  ;;  %v47_v55 = vld [vmem:[%s1383_s0 + $0xc0] sm:$0xff] }
   0xb   :  { %v147_v46 = vsel %vm133_vm0, %v89_v39, 0  ;;  %v30_v48 = vld [vmem:[%s1383_s0 + $0x38] sm:$0xff]  ;;  %v61_v49 = vld [vmem:[%s1383_s0 + $0x130] sm:$0xff]  ;;  %v114_v52 = vpack.c.bf16 %v78_v44, %v77_v43  ;;  %v48_v56 = vld [vmem:[%s1383_s0 + $0xc8] sm:$0xff] }
   0xc   :  { %v62_v50 = vld [vmem:[%s1383_s0 + $0x138] sm:$0xff]  ;;  %v195_v51 = vsel %vm133_vm0, %v105_v40, 0  ;;  %v90_v53 = vpack.c.bf16 %v30_v48, %v29_v45  ;;  %v1142_v57 = vld [vmem:[%s1384_s1] sm:$0xff]   ;;  %v351_v60 = vld [vmem:[%s1386_s3 + $0x8] sm:$0xff]  ;;  %v99_v5 = vpack.c.bf16 %v48_v56, %v47_v55 }
   0xd   :  { %v106_v54 = vpack.c.bf16 %v62_v50, %v61_v49  ;;  %v79_v58 = vld [vmem:[%s1383_s0 + $0x1c0] sm:$0xff]  ;;  %v80_v61 = vld [vmem:[%s1383_s0 + $0x1c8] sm:$0xff]  ;;  %914 = vmatprep.mubr.msk.bf16.mxu0 %vm133_vm0, %v1142_v57  ;;  %934 = vmatprep.mubr.msk.bf16.mxu1 %vm133_vm0, %v1142_v57  ;;  %v352_v63 = vld [vmem:[%s1386_s3 + $0x10] sm:$0xff] }
   0xe   :  { %v350_v59 = vld [vmem:[%s1386_s3] sm:$0xff]  ;;  %v353_v0 = vld [vmem:[%s1386_s3 + $0x18] sm:$0xff]  ;;  %v150_v1 = vsel %vm133_vm0, %v90_v53, 0  ;;  %v32_v4 = vld [vmem:[%s1383_s0 + $0x48] sm:$0xff]  ;;  %v115_v11 = vpack.c.bf16 %v80_v61, %v79_v58 }
   0xf   :  { %901 = vmatpush3.bf16.xpose.msra.mxu0 %v144_v31  ;;  %v354_v62 = vpack.c.bf16 %v351_v60, %v350_v59  ;;  %v198_v2 = vsel %vm133_vm0, %v106_v54, 0  ;;  %v31_v3 = vld [vmem:[%s1383_s0 + $0x40] sm:$0xff]  ;;  %v64_v8 = vld [vmem:[%s1383_s0 + $0x148] sm:$0xff]  ;;  %v355_v12 = vpack.c.bf16 %v353_v0, %v352_v63 }
  0x10   :  { %921 = vmatpush3.bf16.xpose.msra.mxu1 %v192_v33  ;;  %940 = vmatprep.subr.msk.bf16.mxu0 %vm133_vm0, %v97_v32  ;;  %v63_v6 = vld [vmem:[%s1383_s0 + $0x140] sm:$0xff]  ;;  %v891_v10 = vld [vmem:[%s1386_s3 + $0x48] sm:$0xff] }
  0x11   :  { %948 = vmatprep.subr.msk.bf16.mxu1 %vm133_vm0, %v113_v34  ;;  %358 = vperm.xlu0 %957, %v354_v62   ;;  %v890_v9 = vld [vmem:[%s1386_s3 + $0x40] sm:$0xff] }
  0x17   :  { %903 = vmatpush3.bf16.xpose.msra.mxu0 %v147_v46 }
  0x18   :  { %923 = vmatpush3.bf16.xpose.msra.mxu1 %v195_v51  ;;  %941 = vmatprep.subr.msk.bf16.mxu0 %vm133_vm0, %v98_v47 }
  0x19   :  { %949 = vmatprep.subr.msk.bf16.mxu1 %vm133_vm0, %v114_v52 }
  0x1a   :  { %11 = vsyncpa [#allocation4], 0  ;;  %v91_v13 = vpack.c.bf16 %v32_v4, %v31_v3  ;;  %v107_v14 = vpack.c.bf16 %v64_v8, %v63_v6  ;;  %v49_v15 = vld [vmem:[%s1383_s0 + $0xd0] sm:$0xff]  ;;  %v50_v16 = vld [vmem:[%s1383_s0 + $0xd8] sm:$0xff]  ;;  %363 = vperm.xlu0 %957, %v355_v12   ;;  %v689_v17 = vpack.c.bf16 %v891_v10, %v890_v9  ;;  %s991_s13 = smov [#allocation3]  }
  0x1b   :  { %v81_v18 = vld [vmem:[%s1383_s0 + $0x1d0] sm:$0xff]  ;;  %v82_v19 = vld [vmem:[%s1383_s0 + $0x1d8] sm:$0xff]  ;;  %v100_v21 = vpack.c.bf16 %v50_v16, %v49_v15  ;;  %v894_v28 = vld [vmem:[%s1386_s3 + $0x60] sm:$0xff] }
  0x1c   :  { %v153_v20 = vsel %vm133_vm0, %v91_v13, 0  ;;  %v201_v22 = vsel %vm133_vm0, %v107_v14, 0  ;;  %v116_v23 = vpack.c.bf16 %v82_v19, %v81_v18  ;;  %v33_v24 = vld [vmem:[%s1383_s0 + $0x50] sm:$0xff]  ;;  %v34_v25 = vld [vmem:[%s1383_s0 + $0x58] sm:$0xff]  ;;  %v51_v31 = vld [vmem:[%s1383_s0 + $0xe0] sm:$0xff] }
  0x1d   :  { %v65_v26 = vld [vmem:[%s1383_s0 + $0x150] sm:$0xff]  ;;  %v66_v27 = vld [vmem:[%s1383_s0 + $0x158] sm:$0xff]  ;;  %v92_v29 = vpack.c.bf16 %v34_v25, %v33_v24  ;;  %v52_v32 = vld [vmem:[%s1383_s0 + $0xe8] sm:$0xff] }
  0x1e   :  { %693 = vperm.xlu0 %957, %v689_v17   ;;  %v108_v30 = vpack.c.bf16 %v66_v27, %v65_v26  ;;  %v83_v33 = vld [vmem:[%s1383_s0 + $0x1e0] sm:$0xff]  ;;  %v84_v34 = vld [vmem:[%s1383_s0 + $0x1e8] sm:$0xff]  ;;  %v896_v35 = vld [vmem:[%s1386_s3 + $0x70] sm:$0xff]  ;;  %v101_v37 = vpack.c.bf16 %v52_v32, %v51_v31 }
  0x1f   :  { %905 = vmatpush3.bf16.xpose.msra.mxu0 %v150_v1  ;;  %v156_v36 = vsel %vm133_vm0, %v92_v29, 0  ;;  %v117_v39 = vpack.c.bf16 %v84_v34, %v83_v33  ;;  %v35_v40 = vld [vmem:[%s1383_s0 + $0x60] sm:$0xff]  ;;  %v36_v41 = vld [vmem:[%s1383_s0 + $0x68] sm:$0xff]  ;;  %v53_v46 = vld [vmem:[%s1383_s0 + $0xf0] sm:$0xff] }
  0x20   :  { %925 = vmatpush3.bf16.xpose.msra.mxu1 %v198_v2  ;;  %942 = vmatprep.subr.msk.bf16.mxu0 %vm133_vm0, %v99_v5  ;;  %v204_v38 = vsel %vm133_vm0, %v108_v30, 0  ;;  %v67_v42 = vld [vmem:[%s1383_s0 + $0x160] sm:$0xff]  ;;  %v68_v43 = vld [vmem:[%s1383_s0 + $0x168] sm:$0xff]  ;;  %v93_v44 = vpack.c.bf16 %v36_v41, %v35_v40  ;;  %v54_v47 = vld [vmem:[%s1383_s0 + $0xf8] sm:$0xff] }
  0x21   :  { %950 = vmatprep.subr.msk.bf16.mxu1 %vm133_vm0, %v115_v11  ;;  %v109_v45 = vpack.c.bf16 %v68_v43, %v67_v42  ;;  %v85_v48 = vld [vmem:[%s1383_s0 + $0x1f0] sm:$0xff]  ;;  %v86_v49 = vld [vmem:[%s1383_s0 + $0x1f8] sm:$0xff]  ;;  %v102_v51 = vpack.c.bf16 %v54_v47, %v53_v46  ;;  %v960_v63 = vld [vmem:[%s1384_s1 + $0x8] sm:$0xff]  }
  0x22   :  { %740 = vperm.xlu0 %957, %v894_v28   ;;  %v159_v50 = vsel %vm133_vm0, %v93_v44, 0  ;;  %v118_v53 = vpack.c.bf16 %v86_v49, %v85_v48  ;;  %v37_v54 = vld [vmem:[%s1383_s0 + $0x70] sm:$0xff]  ;;  %v38_v55 = vld [vmem:[%s1383_s0 + $0x78] sm:$0xff]  ;;  %v876_v0 = vld [vmem:[%s1386_s3 + $0x20] sm:$0xff] }
  0x23   :  { %v207_v52 = vsel %vm133_vm0, %v109_v45, 0  ;;  %v69_v56 = vld [vmem:[%s1383_s0 + $0x170] sm:$0xff]  ;;  %v70_v58 = vld [vmem:[%s1383_s0 + $0x178] sm:$0xff]  ;;  %v94_v59 = vpack.c.bf16 %v38_v55, %v37_v54  ;;  %v895_v9 = vld [vmem:[%s1386_s3 + $0x68] sm:$0xff] }
  0x24   :  { %v110_v60 = vpack.c.bf16 %v70_v58, %v69_v56  ;;  %v878_v1 = vld [vmem:[%s1386_s3 + $0x30] sm:$0xff]  ;;  %v879_v3 = vld [vmem:[%s1386_s3 + $0x38] sm:$0xff]  ;;  %v962_v54 = vld [vmem:[%s1385_s2 + $0x8] sm:$0xff]  }
  0x25   :  { %v162_v61 = vsel %vm133_vm0, %v94_v59, 0  ;;  %v522_v4 = vpack.c.bf16 %v879_v3, %v878_v1  ;;  %v892_v5 = vld [vmem:[%s1386_s3 + $0x50] sm:$0xff]  ;;  %v893_v6 = vld [vmem:[%s1386_s3 + $0x58] sm:$0xff] }
  0x26   :  { %750 = vperm.xlu0 %957, %v896_v35   ;;  %v210_v62 = vsel %vm133_vm0, %v110_v60, 0  ;;  %v690_v8 = vpack.c.bf16 %v893_v6, %v892_v5  ;;  %v897_v10 = vld [vmem:[%s1386_s3 + $0x78] sm:$0xff] }
  0x27   :  { %907 = vmatpush3.bf16.xpose.msra.mxu0 %v153_v20 }
  0x28   :  { %927 = vmatpush3.bf16.xpose.msra.mxu1 %v201_v22  ;;  %943 = vmatprep.subr.msk.bf16.mxu0 %vm133_vm0, %v100_v21 }
  0x29   :  { %951 = vmatprep.subr.msk.bf16.mxu1 %vm133_vm0, %v116_v23 }
  0x2f   :  { %909 = vmatpush3.bf16.xpose.msra.mxu0 %v156_v36 }
  0x30   :  { %929 = vmatpush3.bf16.xpose.msra.mxu1 %v204_v38  ;;  %944 = vmatprep.subr.msk.bf16.mxu0 %vm133_vm0, %v101_v37 }
  0x31   :  { %952 = vmatprep.subr.msk.bf16.mxu1 %vm133_vm0, %v117_v39 }
  0x37   :  { %911 = vmatpush3.bf16.xpose.msra.mxu0 %v159_v50 }
  0x38   :  { %931 = vmatpush3.bf16.xpose.msra.mxu1 %v207_v52  ;;  %945 = vmatprep.subr.msk.bf16.mxu0 %vm133_vm0, %v102_v51 }
  0x39   :  { %953 = vmatprep.subr.msk.bf16.mxu1 %vm133_vm0, %v118_v53  ;;  %v961_v53 = vld [vmem:[%s1385_s2] sm:$0xff]  }
  0x3f   :  { %913 = vmatpush3.bf16.xpose.msra.mxu0 %v162_v61 }
  0x40   :  { %933 = vmatpush3.bf16.xpose.msra.mxu1 %v210_v62 }
  0x46   :  { %915 = vmatmul.mubr.msk.bf16.vlgmr.msra.gmra.mrb[0].mxu0 %vm133_vm0, %v1142_v57 }
  0x47   :  { %935 = vmatmul.mubr.msk.bf16.vlgmr.msra.gmra.mrb[0].mxu1 %vm133_vm0, %v1142_v57  ;;  %916 = vmatprep.mubr.msk.bf16.mxu0 %vm133_vm0, %v960_v63  ;;  %v877_v57 = vld [vmem:[%s1386_s3 + $0x28] sm:$0xff] }
  0x48   :  { %936 = vmatprep.mubr.msk.bf16.mxu1 %vm133_vm0, %v960_v63  ;;  %v521_v2 = vpack.c.bf16 %v877_v57, %v876_v0 }
  0x4a   :  { %525 = vperm.xlu1 %958, %v521_v2  }
  0x4e   :  { %917 = vmatmul.mubr.msk.bf16.gmra.mrb[4].mxu0 %vm133_vm0, %v960_v63  ;;  %530 = vperm.xlu1 %958, %v522_v4  }
  0x4f   :  { %937 = vmatmul.mubr.msk.bf16.gmra.mrb[4].mxu1 %vm133_vm0, %v960_v63  ;;  %434 = vmatprep.mubr.bf16.mxu0 %v989_v7 }
  0x50   :  { %487 = vmatprep.mubr.bf16.mxu1 %v989_v7 }
  0x52   :  { %698 = vperm.xlu1 %958, %v690_v8  }
  0x56   :  { %745 = vperm.xlu1 %958, %v895_v9  }
  0x5a   :  { %755 = vperm.xlu1 %958, %v897_v10  }
  0x90   :  { %v359_v19 = vpop.permute.xlu0 %358 }
  0x99   :  { %v364_v40 = vpop.permute.xlu0 %363 }
  0xc9   :  { %v526_v0 = vpop.permute.xlu1 %525 }
 0x119   :  { %v270_v11 = vpop.f32.mrb[0].mxu0 }
 0x11a   :  { %v323_v12 = vpop.f32.mrb[0].mxu1  ;;  %v272_v13 = vpop.f32.mrb[1].mxu0 }
 0x11b   :  { %v325_v14 = vpop.f32.mrb[1].mxu1  ;;  %v274_v15 = vpop.f32.mrb[2].mxu0 }
 0x11c   :  { %v342_v16 = vpack.c.bf16 %v274_v15, %v270_v11  ;;  %v327_v17 = vpop.f32.mrb[2].mxu1  ;;  %v276_v18 = vpop.f32.mrb[3].mxu0 }
 0x11d   :  { %v344_v20 = vpack.c.bf16 %v327_v17, %v323_v12  ;;  %v343_v21 = vpack.c.bf16 %v276_v18, %v272_v13  ;;  %v329_v22 = vpop.f32.mrb[3].mxu1 }
 0x11e   :  { %v366_v23 = vadd.bf16 %v359_v19, %v342_v16  ;;  %v345_v24 = vpack.c.bf16 %v329_v22, %v325_v14 }
 0x11f   :  { %v368_v25 = vadd.bf16 %v359_v19, %v344_v20  ;;  %v367_v26 = vadd.bf16 %v359_v19, %v343_v21  ;;  %v531_v21 = vpop.permute.xlu1 %530 }
 0x120   :  { %v369_v27 = vadd.bf16 %v359_v19, %v345_v24  ;;  %v374_v30 = vmax.bf16 %v989_v7, %v366_v23 }
 0x121   :  { %v280_v28 = vpop.f32.mrb[4].mxu0  ;;  %v375_v29 = vmax.bf16 %v989_v7, %v367_v26  ;;  %v376_v34 = vmax.bf16 %v989_v7, %v368_v25 }
 0x122   :  { %v333_v31 = vpop.f32.mrb[4].mxu1  ;;  %v282_v32 = vpop.f32.mrb[5].mxu0  ;;  %v377_v33 = vmax.bf16 %v989_v7, %v369_v27 }
 0x123   :  { %v335_v35 = vpop.f32.mrb[5].mxu1  ;;  %v284_v36 = vpop.f32.mrb[6].mxu0  ;;  %402 = vmatprep.subr.bf16.mxu0 %v375_v29 }
 0x124   :  { %v346_v37 = vpack.c.bf16 %v284_v36, %v280_v28  ;;  %v337_v38 = vpop.f32.mrb[6].mxu1  ;;  %455 = vmatprep.subr.bf16.mxu1 %v377_v33  ;;  %v286_v39 = vpop.f32.mrb[7].mxu0  ;;  %403 = vmatpush1.bf16.msra.mxu0 %v374_v30 }
 0x125   :  { %v348_v41 = vpack.c.bf16 %v337_v38, %v333_v31  ;;  %v347_v42 = vpack.c.bf16 %v286_v39, %v282_v32  ;;  %v339_v43 = vpop.f32.mrb[7].mxu1  ;;  %456 = vmatpush1.bf16.msra.mxu1 %v376_v34  ;;  %v963_v34 = vld [vmem:[%s1385_s2 + $0x10] sm:$0xff]  }
 0x126   :  { %v370_v44 = vadd.bf16 %v364_v40, %v346_v37  ;;  %v349_v45 = vpack.c.bf16 %v339_v43, %v335_v35  ;;  %v964_v35 = vld [vmem:[%s1385_s2 + $0x18] sm:$0xff]  }
 0x127   :  { %v372_v46 = vadd.bf16 %v364_v40, %v348_v41  ;;  %v371_v47 = vadd.bf16 %v364_v40, %v347_v42 }
 0x128   :  { %v373_v48 = vadd.bf16 %v364_v40, %v349_v45  ;;  %v378_v50 = vmax.bf16 %v989_v7, %v370_v44  ;;  %v694_v44 = vpop.permute.xlu0 %693 }
 0x129   :  { %v379_v49 = vmax.bf16 %v989_v7, %v371_v47  ;;  %v380_v52 = vmax.bf16 %v989_v7, %v372_v46 }
 0x12a   :  { %v381_v51 = vmax.bf16 %v989_v7, %v373_v48 }
 0x12b   :  { %404 = vmatprep.subr.bf16.mxu0 %v379_v49 }
 0x12c   :  { %457 = vmatprep.subr.bf16.mxu1 %v381_v51  ;;  %405 = vmatpush1.bf16.msra.mxu0 %v378_v50 }
 0x12d   :  { %458 = vmatpush1.bf16.msra.mxu1 %v380_v52 }
 0x12f   :  { %872 = vmatmul.mubr.msk.bf16.vlgmr.msra.gmra.mrb[8].mxu0 %vm133_vm0, %v961_v53 }
 0x130   :  { %874 = vmatmul.mubr.msk.bf16.vlgmr.msra.gmra.mrb[8].mxu1 %vm133_vm0, %v961_v53  ;;  %444 = vmatprep.mubr.bf16.mxu0 %v989_v7 }
 0x131   :  { %497 = vmatprep.mubr.bf16.mxu1 %v989_v7 }
 0x137   :  { %873 = vmatmul.mubr.msk.bf16.gmra.mrb[12].mxu0 %vm133_vm0, %v962_v54 }
 0x138   :  { %875 = vmatmul.mubr.msk.bf16.gmra.mrb[12].mxu1 %vm133_vm0, %v962_v54  ;;  %602 = vmatprep.mubr.bf16.mxu0 %v989_v7  ;;  %v699_v54 = vpop.permute.xlu1 %698 }
 0x139   :  { %655 = vmatprep.mubr.bf16.mxu1 %v989_v7 }
 0x202   :  { %v436_v55 = vpop.f32.mrb[8].mxu0 }
 0x203   :  { %v489_v56 = vpop.f32.mrb[8].mxu1  ;;  %v438_v58 = vpop.f32.mrb[9].mxu0 }
 0x204   :  { %v491_v59 = vpop.f32.mrb[9].mxu1  ;;  %v440_v60 = vpop.f32.mrb[10].mxu0 }
 0x205   :  { %v508_v61 = vpack.c.bf16 %v440_v60, %v436_v55  ;;  %v493_v62 = vpop.f32.mrb[10].mxu1  ;;  %v442_v63 = vpop.f32.mrb[11].mxu0 }
 0x206   :  { %v510_v57 = vpack.c.bf16 %v493_v62, %v489_v56  ;;  %v509_v1 = vpack.c.bf16 %v442_v63, %v438_v58  ;;  %v495_v2 = vpop.f32.mrb[11].mxu1 }
 0x207   :  { %v533_v3 = vadd.bf16 %v526_v0, %v508_v61  ;;  %v511_v4 = vpack.c.bf16 %v495_v2, %v491_v59 }
 0x208   :  { %v535_v5 = vadd.bf16 %v526_v0, %v510_v57  ;;  %v534_v6 = vadd.bf16 %v526_v0, %v509_v1 }
 0x209   :  { %v536_v8 = vadd.bf16 %v526_v0, %v511_v4  ;;  %v541_v11 = vmax.bf16 %v989_v7, %v533_v3 }
 0x20a   :  { %v446_v9 = vpop.f32.mrb[12].mxu0  ;;  %v542_v10 = vmax.bf16 %v989_v7, %v534_v6  ;;  %v543_v15 = vmax.bf16 %v989_v7, %v535_v5 }
 0x20b   :  { %v499_v12 = vpop.f32.mrb[12].mxu1  ;;  %v448_v13 = vpop.f32.mrb[13].mxu0  ;;  %v544_v14 = vmax.bf16 %v989_v7, %v536_v8 }
 0x20c   :  { %v501_v16 = vpop.f32.mrb[13].mxu1  ;;  %v450_v17 = vpop.f32.mrb[14].mxu0  ;;  %570 = vmatprep.subr.bf16.mxu0 %v542_v10 }
 0x20d   :  { %v512_v18 = vpack.c.bf16 %v450_v17, %v446_v9  ;;  %v503_v19 = vpop.f32.mrb[14].mxu1  ;;  %623 = vmatprep.subr.bf16.mxu1 %v544_v14  ;;  %v452_v20 = vpop.f32.mrb[15].mxu0  ;;  %571 = vmatpush1.bf16.msra.mxu0 %v541_v11 }
 0x20e   :  { %v514_v22 = vpack.c.bf16 %v503_v19, %v499_v12  ;;  %v513_v23 = vpack.c.bf16 %v452_v20, %v448_v13  ;;  %v505_v24 = vpop.f32.mrb[15].mxu1  ;;  %624 = vmatpush1.bf16.msra.mxu1 %v543_v15  ;;  %v741_v9 = vpop.permute.xlu0 %740 }
 0x20f   :  { %v537_v25 = vadd.bf16 %v531_v21, %v512_v18  ;;  %v515_v26 = vpack.c.bf16 %v505_v24, %v501_v16  ;;  %v746_v14 = vpop.permute.xlu1 %745 }
 0x210   :  { %v539_v27 = vadd.bf16 %v531_v21, %v514_v22  ;;  %v538_v28 = vadd.bf16 %v531_v21, %v513_v23 }
 0x211   :  { %v540_v29 = vadd.bf16 %v531_v21, %v515_v26  ;;  %v545_v31 = vmax.bf16 %v989_v7, %v537_v25 }
 0x212   :  { %v546_v30 = vmax.bf16 %v989_v7, %v538_v28  ;;  %v547_v33 = vmax.bf16 %v989_v7, %v539_v27 }
 0x213   :  { %v548_v32 = vmax.bf16 %v989_v7, %v540_v29 }
 0x214   :  { %572 = vmatprep.subr.bf16.mxu0 %v546_v30 }
 0x215   :  { %625 = vmatprep.subr.bf16.mxu1 %v548_v32  ;;  %573 = vmatpush1.bf16.msra.mxu0 %v545_v31 }
 0x216   :  { %626 = vmatpush1.bf16.msra.mxu1 %v547_v33 }
 0x218   :  { %886 = vmatmul.mubr.msk.bf16.vlgmr.msra.gmra.mrb[16].mxu0 %vm133_vm0, %v963_v34 }
 0x219   :  { %888 = vmatmul.mubr.msk.bf16.vlgmr.msra.gmra.mrb[16].mxu1 %vm133_vm0, %v963_v34  ;;  %612 = vmatprep.mubr.bf16.mxu0 %v989_v7 }
 0x21a   :  { %665 = vmatprep.mubr.bf16.mxu1 %v989_v7 }
 0x220   :  { %887 = vmatmul.mubr.msk.bf16.gmra.mrb[20].mxu0 %vm133_vm0, %v964_v35 }
 0x221   :  { %889 = vmatmul.mubr.msk.bf16.gmra.mrb[20].mxu1 %vm133_vm0, %v964_v35  ;;  %v751_v35 = vpop.permute.xlu0 %750 }
 0x2eb   :  { %v604_v36 = vpop.f32.mrb[16].mxu0 }
 0x2ec   :  { %v657_v37 = vpop.f32.mrb[16].mxu1  ;;  %v606_v38 = vpop.f32.mrb[17].mxu0 }
 0x2ed   :  { %v659_v39 = vpop.f32.mrb[17].mxu1  ;;  %v608_v40 = vpop.f32.mrb[18].mxu0 }
 0x2ee   :  { %v676_v41 = vpack.c.bf16 %v608_v40, %v604_v36  ;;  %v661_v42 = vpop.f32.mrb[18].mxu1  ;;  %v610_v43 = vpop.f32.mrb[19].mxu0 }
 0x2ef   :  { %v678_v45 = vpack.c.bf16 %v661_v42, %v657_v37  ;;  %v677_v46 = vpack.c.bf16 %v610_v43, %v606_v38  ;;  %v663_v47 = vpop.f32.mrb[19].mxu1 }
 0x2f0   :  { %v701_v48 = vadd.bf16 %v694_v44, %v676_v41  ;;  %v679_v49 = vpack.c.bf16 %v663_v47, %v659_v39 }
 0x2f1   :  { %v703_v50 = vadd.bf16 %v694_v44, %v678_v45  ;;  %v702_v51 = vadd.bf16 %v694_v44, %v677_v46 }
 0x2f2   :  { %v709_v52 = vmax.bf16 %v989_v7, %v701_v48  ;;  %v704_v53 = vadd.bf16 %v694_v44, %v679_v49  ;;  %v756_v44 = vpop.permute.xlu1 %755 }
 0x2f3   :  { %v711_v55 = vmax.bf16 %v989_v7, %v703_v50  ;;  %v614_v56 = vpop.f32.mrb[20].mxu0  ;;  %v710_v58 = vmax.bf16 %v989_v7, %v702_v51 }
 0x2f4   :  { %v667_v59 = vpop.f32.mrb[20].mxu1  ;;  %v616_v60 = vpop.f32.mrb[21].mxu0  ;;  %v712_v61 = vmax.bf16 %v989_v7, %v704_v53  ;;  %v722_v0 = vunpack.c.l.bf16 %v709_v52  ;;  %v726_v2 = vunpack.c.h.bf16 %v709_v52 }
 0x2f5   :  { %v669_v62 = vpop.f32.mrb[21].mxu1  ;;  %v618_v63 = vpop.f32.mrb[22].mxu0  ;;  %v724_v3 = vunpack.c.l.bf16 %v711_v55  ;;  %v728_v5 = vunpack.c.h.bf16 %v711_v55  ;;  %v723_v6 = vunpack.c.l.bf16 %v710_v58  ;;  %v727_v10 = vunpack.c.h.bf16 %v710_v58 }
 0x2f6   :  { %v671_v57 = vpop.f32.mrb[22].mxu1  ;;  %v620_v1 = vpop.f32.mrb[23].mxu0  ;;  %v680_v8 = vpack.c.bf16 %v618_v63, %v614_v56  ;;  %v725_v11 = vunpack.c.l.bf16 %v712_v61  ;;  %v758_v15 = vmul.f32 %v741_v9, %v722_v0  ;;  %v729_v16 = vunpack.c.h.bf16 %v712_v61 }
 0x2f7   :  { %v673_v4 = vpop.f32.mrb[23].mxu1  ;;  %v682_v12 = vpack.c.bf16 %v671_v57, %v667_v59  ;;  %v681_v13 = vpack.c.bf16 %v620_v1, %v616_v60  ;;  %v762_v19 = vmul.f32 %v746_v14, %v726_v2  ;;  %v760_v20 = vmul.f32 %v741_v9, %v724_v3 }
 0x2f8   :  { %v705_v17 = vadd.bf16 %v699_v54, %v680_v8  ;;  %v683_v18 = vpack.c.bf16 %v673_v4, %v669_v62  ;;  %v764_v23 = vmul.f32 %v746_v14, %v728_v5  ;;  %v759_v24 = vmul.f32 %v741_v9, %v723_v6 }
 0x2f9   :  { %v707_v21 = vadd.bf16 %v699_v54, %v682_v12  ;;  %v706_v22 = vadd.bf16 %v699_v54, %v681_v13  ;;  %v763_v27 = vmul.f32 %v746_v14, %v727_v10  ;;  %v761_v28 = vmul.f32 %v741_v9, %v725_v11 }
 0x2fa   :  { %v713_v25 = vmax.bf16 %v989_v7, %v705_v17  ;;  %v708_v26 = vadd.bf16 %v699_v54, %v683_v18  ;;  %v765_v31 = vmul.f32 %v746_v14, %v729_v16  ;;  %v774_v40 = vadd.f32 %v762_v19, %v758_v15 }
 0x2fb   :  { %v715_v29 = vmax.bf16 %v989_v7, %v707_v21  ;;  %v714_v30 = vmax.bf16 %v989_v7, %v706_v22  ;;  %v792_v45 = vadd.f32 %v764_v23, %v760_v20  ;;  %v783_v46 = vadd.f32 %v763_v27, %v759_v24 }
 0x2fc   :  { %v730_v32 = vunpack.c.l.bf16 %v713_v25  ;;  %v734_v33 = vunpack.c.h.bf16 %v713_v25  ;;  %v716_v34 = vmax.bf16 %v989_v7, %v708_v26  ;;  %v801_v49 = vadd.f32 %v765_v31, %v761_v28 }
 0x2fd   :  { %v732_v36 = vunpack.c.l.bf16 %v715_v29  ;;  %v736_v37 = vunpack.c.h.bf16 %v715_v29  ;;  %v731_v38 = vunpack.c.l.bf16 %v714_v30  ;;  %v735_v39 = vunpack.c.h.bf16 %v714_v30 }
 0x2fe   :  { %v766_v41 = vmul.f32 %v751_v35, %v730_v32  ;;  %v733_v42 = vunpack.c.l.bf16 %v716_v34  ;;  %v737_v43 = vunpack.c.h.bf16 %v716_v34  ;;  %v770_v50 = vmul.f32 %v756_v44, %v734_v33 }
 0x2ff   :  { %v768_v47 = vmul.f32 %v751_v35, %v732_v36  ;;  %v767_v48 = vmul.f32 %v751_v35, %v731_v38  ;;  %v772_v53 = vmul.f32 %v756_v44, %v736_v37  ;;  %v771_v54 = vmul.f32 %v756_v44, %v735_v39 }
 0x300   :  { %v775_v51 = vadd.f32 %v774_v40, %v766_v41  ;;  %v769_v52 = vmul.f32 %v751_v35, %v733_v42  ;;  %v773_v58 = vmul.f32 %v756_v44, %v737_v43  ;;  %v990_v10 = vmov 1966171168  }
 0x301   :  { %v793_v7 = vadd.f32 %v792_v45, %v768_v47  ;;  %v784_v55 = vadd.f32 %v783_v46, %v767_v48  ;;  %v823_v11 = vunpack.c.l.s4 %v990_v10  ;;  %v825_v12 = vlaneseq }
 0x302   :  { %v776_v56 = vadd.f32 %v775_v51, %v770_v50  ;;  %v802_v59 = vadd.f32 %v801_v49, %v769_v52  ;;  %v811_v19 = vstv %s1387_s4  ;;  %s856_s4 = sshll.u32 %s991_s13, 4  ;;  %s857_s4 = int_to_ptr.vmem [resolvable:$true] %s856_s4 }
 0x303   :  { %v794_v60 = vadd.f32 %v793_v7, %v772_v53  ;;  %v785_v61 = vadd.f32 %v784_v55, %v771_v54  ;;  %v824_v22 = vunpack.c.0.s8 %v823_v11  ;;  %v826_v23 = vshrl.u32 %v825_v12, 7  ;;  %s965_s14 = scalar_lea.vmem %s857_s4, 64  ;;  %p970_p1 = scmp.lt.s32.totalorder %s857_s4, %s857_s4 }
 0x304   :  { %v777_v62 = vrot.slane %v776_v56, 4  ;;  %v803_v63 = vadd.f32 %v802_v59, %v773_v58  ;;  %vm847_vm1 = vcmp.lt.s32.totalorder %v825_v12, 512  ;;  %p966_p0 = scmp.ne.s32.totalorder %s857_s4, %s965_s14  ;;  %p971_p2 = scmp.lt.s32.totalorder %s965_s14, %s965_s14 }
 0x305   :  { %v795_v0 = vrot.slane %v794_v60, 4  ;;  %v786_v57 = vrot.slane %v785_v61, 4  ;;  %v827_v32 = vsub.s32 %v824_v22, %v826_v23 }
 0x306   :  { %v778_v1 = vadd.f32 %v777_v62, %v776_v56  ;;  %v804_v2 = vrot.slane %v803_v63, 4  ;;  %p972_p3 = por %p971_p2, %p970_p1 }
 0x307   :  { %v796_v3 = vadd.f32 %v795_v0, %v794_v60  ;;  %v787_v4 = vadd.f32 %v786_v57, %v785_v61 }
 0x308   :  { %v779_v5 = vrot.slane %v778_v1, 2  ;;  %v805_v6 = vadd.f32 %v804_v2, %v803_v63  ;;  %p973_p4 = pnand %p972_p3, %p966_p0 }
 0x309   :  { %v797_v8 = vrot.slane %v796_v3, 2  ;;  %v788_v9 = vrot.slane %v787_v4, 2 }
 0x30a   :  { %v780_v13 = vadd.f32 %v779_v5, %v778_v1  ;;  %v806_v14 = vrot.slane %v805_v6, 2 }
 0x30b   :  { %v798_v15 = vadd.f32 %v797_v8, %v796_v3  ;;  %v789_v16 = vadd.f32 %v788_v9, %v787_v4 }
 0x30c   :  { %v807_v17 = vadd.f32 %v806_v14, %v805_v6  ;;  %v781_v18 = vrot.slane %v780_v13, 1 }
 0x30d   :  { %v790_v20 = vrot.slane %v789_v16, 1  ;;  %v799_v21 = vrot.slane %v798_v15, 1 }
 0x30e   :  { %v782_v24 = vadd.f32 %v781_v18, %v780_v13  ;;  %v808_v25 = vrot.slane %v807_v17, 1 }
 0x30f   :  { %v791_v26 = vadd.f32 %v790_v20, %v789_v16  ;;  %v800_v27 = vadd.f32 %v799_v21, %v798_v15 }
 0x310   :  { %v809_v28 = vadd.f32 %v808_v25, %v807_v17  ;;  %v812_v29 = vadd.f32 %v811_v19, %v782_v24 }
 0x311   :  { %v813_v30 = vadd.f32 %v811_v19, %v791_v26  ;;  %v814_v31 = vadd.f32 %v811_v19, %v800_v27 }
 0x312   :  { %v815_v33 = vadd.f32 %v811_v19, %v809_v28 }
 0x313   :  { %v820_v34 = vcombine.low %v812_v29, %v813_v30 }
 0x314   :  { %v821_v35 = vcombine.low %v814_v31, %v815_v33 }
 0x315   :  { %v828_v36 = vrot.slane %v820_v34, %v827_v32 }
 0x316   :  { %v835_v37 = vrot.slane %v821_v35, %v827_v32 }
 0x318   :  { %v836_v38 = vcombine.low %v828_v36, %v835_v37 }
 0x31a   :  { %v843_v39 = vrot.slane %v836_v38, %v827_v32 }
 0x31c   :  { %849 = vst.msk [vmem:[#allocation3] sm:$0xf] %vm847_vm1, %v843_v39 }
 0x31d   :  { %976 = shalt.err (!%p973_p4)
}
 0x31e   :  { %s977_s1 = scalar_lea.hbm %s1388_s5, 64 }
 0x31f   :  { %p978_p5 = scmp.ne.s32.totalorder %s1388_s5, %s977_s1  ;;  %p981_p6 = scmp.lt.u32.totalorder %s977_s1, %s1388_s5 }
 0x321   :  { %p983_p7 = pnand %p981_p6, %p978_p5 }
 0x323   :  { %986 = shalt.err (!%p983_p7)
}
 0x324   :  { %859 = dma.vmem_to_hbm [thread:$0]  %s857_s4, 64, %s1388_s5, [#allocation4]  }
 0x325   :  { %987 = dma.done.wait [#allocation4], 64  }
 0x326   :  { %988 = vsyncadd [#allocation4], 4294967232 }
 0x327   :  { %863 = vsyncpa [#allocation4], 1 }

</bundles_post_ra>
